<compile_context>
chip_gen: v6e
topology: v6e:2x2x1
jax: 0.10.0
libtpu: 0.0.40
codegen_flags: <defaults>
</compile_context>

<pallas_src>
import jax
import jax.numpy as jnp
from jax.experimental import pallas as pl
from jax.experimental.pallas import tpu as pltpu


N_IN = 512        # fc1 input features
N_HID = 256       # fc1/bn1 output features
N_CLASSES = 205   # fc2/bn2 output features (true head width)
N_OUT_PAD = 256   # lane-dense padded head width (205 -> 256)
_BN_EPS = 1e-5
_NEG_BIG = -1e30  # finite "minus infinity" baked into padded head lanes

_MAX_TILE_M = 2048
_VMEM_LIMIT = 48 * 1024 * 1024   # v7x-safe (< 64 MiB physical per TC)


# ----------------------------------------------------------------------------
# Fused kernel: relu(x@W1 + b1) @ W2 + b2 -> log_softmax (mask folded into b2)
# ----------------------------------------------------------------------------
def _classnet_kernel(x_ref, w1_ref, b1_ref, w2_ref, b2_ref, o_ref):
    # fc1 + folded-BN1 + ReLU.  x cast to bf16 in-kernel (no wrapper pass).
    x = x_ref[...].astype(jnp.bfloat16)
    h = jnp.dot(x, w1_ref[...], preferred_element_type=jnp.float32)
    h = jnp.maximum(h + b1_ref[...], 0.0)

    # fc2 + folded-BN2.  Padded lanes get a -1e30 bias -> exp underflows to 0,
    # so no explicit mask ops are needed in the log_softmax epilogue.
    logits = jnp.dot(h.astype(jnp.bfloat16), w2_ref[...],
                     preferred_element_type=jnp.float32) + b2_ref[...]

    m = jnp.max(logits, axis=-1, keepdims=True)
    e = jnp.exp(logits - m)
    lse = jnp.log(jnp.sum(e, axis=-1, keepdims=True))
    o_ref[...] = ((logits - m) - lse).astype(o_ref.dtype)


def _round_up(x, m):
    return (x + m - 1) // m * m


def _choose_tile_m(B):
    """Biggest useful M tile; keeps >=2 grid steps for large B (v7x megacore)."""
    if B < 8:
        return B                       # single full-extent block (allowed)
    if B <= 512:
        return _round_up(B, 8)         # one block; small-batch latency case
    # Large batch: big tiles amortize per-step overhead, but keep >= 2 steps so
    # both v7x TensorCores get work.  Multiple of 256 keeps layout clean.
    return min(_MAX_TILE_M, _round_up(pl.cdiv(B, 2), 256))


def classification_forward(params, x):
    """x: (B, 512) float32 (or bf16) -> (B, 205) f32 log-probabilities."""
    B, K = x.shape
    assert K == N_IN, (K, N_IN)

    tile_m = _choose_tile_m(B)
    grid_m = pl.cdiv(B, tile_m)

    # VMEM guard: double-buffered x tile + out tile + (double-buffered) weights.
    weight_bytes = (N_IN * N_HID * 2 + N_HID * N_OUT_PAD * 2
                    + (N_HID + N_OUT_PAD) * 4)
    per_row_bytes = N_IN * x.dtype.itemsize + N_OUT_PAD * 4
    assert 2 * tile_m * per_row_bytes + 2 * weight_bytes < _VMEM_LIMIT, tile_m

    cost = pl.CostEstimate(
        flops=2 * B * (N_IN * N_HID + N_HID * N_OUT_PAD),
        transcendentals=B * (N_OUT_PAD + 1),
        bytes_accessed=B * per_row_bytes + weight_bytes,
    )

    out = pl.pallas_call(
        _classnet_kernel,
        out_shape=jax.ShapeDtypeStruct((B, N_OUT_PAD), jnp.float32),
        grid_spec=pltpu.PrefetchScalarGridSpec(
            num_scalar_prefetch=0,
            grid=(grid_m,),
            in_specs=[
                pl.BlockSpec((tile_m, N_IN), lambda i: (i, 0)),
                pl.BlockSpec((N_IN, N_HID), lambda i: (0, 0)),
                pl.BlockSpec((1, N_HID), lambda i: (0, 0)),
                pl.BlockSpec((N_HID, N_OUT_PAD), lambda i: (0, 0)),
                pl.BlockSpec((1, N_OUT_PAD), lambda i: (0, 0)),
            ],
            out_specs=pl.BlockSpec((tile_m, N_OUT_PAD), lambda i: (i, 0)),
        ),
        compiler_params=pltpu.CompilerParams(
            dimension_semantics=("parallel",),
            vmem_limit_bytes=_VMEM_LIMIT,
        ),
        cost_estimate=cost,
    )(x, params["w1"], params["b1"], params["w2"], params["b2"])

    # NOTE: if downstream can consume the lane-dense padded (B, 256) block,
    # return `out` directly and skip this narrowing slice (saves an HBM pass).
    return out[:, :N_CLASSES]


# ----------------------------------------------------------------------------
# Deterministic synthetic parameters with eval-mode BN folded into W / bias
# ----------------------------------------------------------------------------
def init_params(key):
    k = jax.random.split(key, 8)
    w1 = jax.random.normal(k[0], (N_IN, N_HID), jnp.float32) * N_IN ** -0.5
    b1 = 0.05 * jax.random.normal(k[1], (N_HID,), jnp.float32)
    g1 = 1.0 + 0.1 * jax.random.normal(k[2], (N_HID,), jnp.float32)
    be1 = 0.05 * jax.random.normal(k[3], (N_HID,), jnp.float32)

    w2 = jax.random.normal(k[4], (N_HID, N_CLASSES), jnp.float32) * N_HID ** -0.5
    b2 = 0.05 * jax.random.normal(k[5], (N_CLASSES,), jnp.float32)
    g2 = 1.0 + 0.1 * jax.random.normal(k[6], (N_CLASSES,), jnp.float32)
    be2 = 0.05 * jax.random.normal(k[7], (N_CLASSES,), jnp.float32)

    # eval-mode BN (mean=0, var=1): BN(y) = scale*y + beta, scale = gamma/sqrt(1+eps)
    # TODO(synk): if real running statistics are loaded, fold them here instead.
    s1 = g1 / jnp.sqrt(1.0 + _BN_EPS)
    s2 = g2 / jnp.sqrt(1.0 + _BN_EPS)

    # Fold the scale into weight columns; keep only the bias for the epilogue.
    w1f = (w1 * s1[None, :]).astype(jnp.bfloat16)
    b1f = (s1 * b1 + be1).reshape(1, N_HID).astype(jnp.float32)
    w2f = w2 * s2[None, :]
    b2f = s2 * b2 + be2

    # Zero-pad the 205-wide head to 256 lanes; padded-lane bias = -1e30 bakes the
    # class mask into the bias (exp underflows to 0 inside the kernel).
    w2p = jnp.zeros((N_HID, N_OUT_PAD), jnp.float32).at[:, :N_CLASSES].set(w2f)
    b2p = jnp.full((1, N_OUT_PAD), _NEG_BIG, jnp.float32).at[0, :N_CLASSES].set(b2f)

    return {
        "w1": w1f,
        "b1": b1f,
        "w2": w2p.astype(jnp.bfloat16),
        "b2": b2p,
    }


def reference_forward(params, x):
    """Pure-JAX reference using the same (bf16-stored) weights, f32 math."""
    w1 = params["w1"].astype(jnp.float32)
    w2 = params["w2"].astype(jnp.float32)
    h = jnp.maximum(x.astype(jnp.float32) @ w1 + params["b1"], 0.0)
    logits = (h @ w2 + params["b2"])[:, :N_CLASSES]
    return jax.nn.log_softmax(logits, axis=-1)


# ----------------------------------------------------------------------------
if __name__ == "__main__":
    key = jax.random.PRNGKey(0)
    kp, kx = jax.random.split(key)
    params = init_params(kp)

    fwd = jax.jit(classification_forward)

    # Small primary test plus a ragged batch and a multi-tile batch to exercise
    # the cdiv grid / large-tile paths.
    for B in (8, 300, 1030):
        xb = jax.random.normal(jax.random.fold_in(kx, B), (B, N_IN), jnp.float32)
        out = jax.block_until_ready(fwd(params, xb))

        assert out.shape == (B, N_CLASSES), out.shape
        assert bool(jnp.isfinite(out).all())
        # log_softmax rows must (approximately) normalize over the 205 classes
        row_sums = jnp.sum(jnp.exp(out), axis=-1)
        assert bool(jnp.all(jnp.abs(row_sums - 1.0) < 1e-2)), row_sums

        ref = reference_forward(params, xb)
        max_err = float(jnp.max(jnp.abs(out - ref)))
        assert max_err < 0.15, (B, max_err)   # bf16 MXU vs f32 reference tolerance

    print("KERNEL_OK")
</pallas_src>

<mosaic_0001>
module attributes {stable_mosaic.version = 11 : i64} {
  func.func @_classnet_kernel(%arg0: i32, %arg1: memref<8x512xf32, #tpu.memory_space<vmem>>, %arg2: memref<512x256xbf16, #tpu.memory_space<vmem>>, %arg3: memref<1x256xf32, #tpu.memory_space<vmem>>, %arg4: memref<256x256xbf16, #tpu.memory_space<vmem>>, %arg5: memref<1x256xf32, #tpu.memory_space<vmem>>, %arg6: memref<8x256xf32, #tpu.memory_space<vmem>>) attributes {dimension_semantics = [#tpu.dimension_semantics<parallel>], iteration_bounds = array<i64: 1>, scalar_prefetch = 0 : i64, scratch_operands = 0 : i64, tpu.core_type = #tpu.core_type<tc>, window_params = [{transform_indices = @transform_0, window_bounds = array<i64: 8, 512>}, {pipeline_mode = #tpu.pipeline_mode<synchronous>, transform_indices = @transform_1, window_bounds = array<i64: 512, 256>}, {pipeline_mode = #tpu.pipeline_mode<synchronous>, transform_indices = @transform_2, window_bounds = array<i64: 1, 256>}, {pipeline_mode = #tpu.pipeline_mode<synchronous>, transform_indices = @transform_3, window_bounds = array<i64: 256, 256>}, {pipeline_mode = #tpu.pipeline_mode<synchronous>, transform_indices = @transform_4, window_bounds = array<i64: 1, 256>}, {transform_indices = @transform_5, window_bounds = array<i64: 8, 256>}]} {
    %c0 = arith.constant 0 : index
    %c0_0 = arith.constant 0 : index
    %0 = vector.load %arg1[%c0, %c0_0] : memref<8x512xf32, #tpu.memory_space<vmem>>, vector<8x512xf32>
    %1 = arith.truncf %0 : vector<8x512xf32> to vector<8x512xbf16>
    %c0_1 = arith.constant 0 : index
    %c0_2 = arith.constant 0 : index
    %2 = vector.load %arg2[%c0_1, %c0_2] : memref<512x256xbf16, #tpu.memory_space<vmem>>, vector<512x256xbf16>
    %cst = arith.constant dense<0.000000e+00> : vector<8x256xf32>
    %3 = tpu.matmul %1, %2, %cst {dimension_numbers = #tpu.dot_dimension_numbers<[1], [0], [0], [1], [0, 0, 1, 1], [], []>} : vector<8x512xbf16>, vector<512x256xbf16>, vector<8x256xf32> -> vector<8x256xf32>
    %c0_3 = arith.constant 0 : index
    %c0_4 = arith.constant 0 : index
    %4 = vector.load %arg3[%c0_3, %c0_4] : memref<1x256xf32, #tpu.memory_space<vmem>>, vector<1x256xf32>
    %5 = vector.broadcast %4 : vector<1x256xf32> to vector<8x256xf32>
    %6 = arith.addf %3, %5 : vector<8x256xf32>
    %cst_5 = arith.constant 0.000000e+00 : f32
    %7 = vector.broadcast %cst_5 : f32 to vector<8x256xf32>
    %8 = arith.maximumf %6, %7 : vector<8x256xf32>
    %9 = arith.truncf %8 : vector<8x256xf32> to vector<8x256xbf16>
    %c0_6 = arith.constant 0 : index
    %c0_7 = arith.constant 0 : index
    %10 = vector.load %arg4[%c0_6, %c0_7] : memref<256x256xbf16, #tpu.memory_space<vmem>>, vector<256x256xbf16>
    %cst_8 = arith.constant dense<0.000000e+00> : vector<8x256xf32>
    %11 = tpu.matmul %9, %10, %cst_8 {dimension_numbers = #tpu.dot_dimension_numbers<[1], [0], [0], [1], [0, 0, 1, 1], [], []>} : vector<8x256xbf16>, vector<256x256xbf16>, vector<8x256xf32> -> vector<8x256xf32>
    %c0_9 = arith.constant 0 : index
    %c0_10 = arith.constant 0 : index
    %12 = vector.load %arg5[%c0_9, %c0_10] : memref<1x256xf32, #tpu.memory_space<vmem>>, vector<1x256xf32>
    %13 = vector.broadcast %12 : vector<1x256xf32> to vector<8x256xf32>
    %14 = arith.addf %11, %13 : vector<8x256xf32>
    %cst_11 = arith.constant dense<0xFF800000> : vector<8xf32>
    %15 = vector.multi_reduction <maximumf>, %14, %cst_11 [1] : vector<8x256xf32> to vector<8xf32>
    %16 = vector.shape_cast %15 : vector<8xf32> to vector<8x1xf32>
    %17 = vector.broadcast %16 : vector<8x1xf32> to vector<8x256xf32>
    %18 = arith.subf %14, %17 : vector<8x256xf32>
    %19 = math.exp %18 : vector<8x256xf32>
    %cst_12 = arith.constant dense<0.000000e+00> : vector<8xf32>
    %20 = vector.multi_reduction <add>, %19, %cst_12 [1] : vector<8x256xf32> to vector<8xf32>
    %21 = vector.shape_cast %20 : vector<8xf32> to vector<8x1xf32>
    %22 = math.log %21 : vector<8x1xf32>
    %23 = vector.broadcast %16 : vector<8x1xf32> to vector<8x256xf32>
    %24 = arith.subf %14, %23 : vector<8x256xf32>
    %25 = vector.broadcast %22 : vector<8x1xf32> to vector<8x256xf32>
    %26 = arith.subf %24, %25 : vector<8x256xf32>
    %c0_13 = arith.constant 0 : index
    %c0_14 = arith.constant 0 : index
    %27 = vector.load %arg6[%c0_13, %c0_14] : memref<8x256xf32, #tpu.memory_space<vmem>>, vector<8x256xf32>
    tpu.vector_store %arg6[%c0_13, %c0_14], %26 {strides = array<i32>} : memref<8x256xf32, #tpu.memory_space<vmem>>, vector<8x256xf32>,
    return
  }
  func.func @transform_0(%arg0: i32) -> (i32, i32) {
    %c0_i32 = arith.constant 0 : i32
    %c0_i32_0 = arith.constant 0 : i32
    return %arg0, %c0_i32 : i32, i32
  }
  func.func @transform_1(%arg0: i32) -> (i32, i32) {
    %c0_i32 = arith.constant 0 : i32
    %c0_i32_0 = arith.constant 0 : i32
    %c0_i32_1 = arith.constant 0 : i32
    return %c0_i32, %c0_i32_0 : i32, i32
  }
  func.func @transform_2(%arg0: i32) -> (i32, i32) {
    %c0_i32 = arith.constant 0 : i32
    %c0_i32_0 = arith.constant 0 : i32
    %c0_i32_1 = arith.constant 0 : i32
    return %c0_i32, %c0_i32_0 : i32, i32
  }
  func.func @transform_3(%arg0: i32) -> (i32, i32) {
    %c0_i32 = arith.constant 0 : i32
    %c0_i32_0 = arith.constant 0 : i32
    %c0_i32_1 = arith.constant 0 : i32
    return %c0_i32, %c0_i32_0 : i32, i32
  }
  func.func @transform_4(%arg0: i32) -> (i32, i32) {
    %c0_i32 = arith.constant 0 : i32
    %c0_i32_0 = arith.constant 0 : i32
    %c0_i32_1 = arith.constant 0 : i32
    return %c0_i32, %c0_i32_0 : i32, i32
  }
  func.func @transform_5(%arg0: i32) -> (i32, i32) {
    %c0_i32 = arith.constant 0 : i32
    %c0_i32_0 = arith.constant 0 : i32
    return %arg0, %c0_i32 : i32, i32
  }
}

</mosaic_0001>

<bundles_post_ra>
// kernel: classification_forward.1
= control target key start
LH: loop header
LB: loop body
LE: loop exit
PB: predicated region body
PF: predicated region fallthrough
CT: control target
= control target key end

     0   :  { %10 = vsyncpa [#allocation3], 0  ;;  %s1291_s0 = inlined_call_operand.hbm [shape: f32[8,512], index: 0, kind: input, shape index: {}]   ;;  %s1292_s1 = inlined_call_operand.hbm [shape: bf16[512,256], index: 1, kind: input, shape index: {}]   ;;  %s1293_s2 = inlined_call_operand.hbm [shape: f32[1,256], index: 2, kind: input, shape index: {}]   ;;  %s1294_s3 = inlined_call_operand.hbm [shape: bf16[256,256], index: 3, kind: input, shape index: {}]   ;;  %s1295_s4 = inlined_call_operand.hbm [shape: f32[1,256], index: 4, kind: input, shape index: {}]   ;;  %s1296_s5 = inlined_call_operand.hbm [shape: f32[8,256], index: 5, kind: output, shape index: {}]  }
   0x1   :  { %11 = vsyncpa [#allocation6], 0 }
   0x2   :  { %12 = vsyncpa [#allocation9], 0 }
   0x3   :  { %13 = vsyncpa [#allocation4], 0  ;;  %s1235_s18 = smov [#allocation5]  }
   0x4   :  { %s29_s19 = sshll.u32 %s1235_s18, 4  ;;  %s30_s19 = int_to_ptr.vmem [resolvable:$true] %s29_s19 }
   0x5   :  { %s1115_s20 = scalar_lea.vmem %s30_s19, 8192  ;;  %p1120_p1 = scmp.lt.s32.totalorder %s30_s19, %s30_s19 }
   0x6   :  { %p1116_p0 = scmp.ne.s32.totalorder %s30_s19, %s1115_s20  ;;  %p1121_p2 = scmp.lt.s32.totalorder %s1115_s20, %s1115_s20 }
   0x8   :  { %p1122_p3 = por %p1121_p2, %p1120_p1 }
   0xa   :  { %p1123_p4 = pnand %p1122_p3, %p1116_p0 }
   0xc   :  { %1126 = shalt.err (!%p1123_p4)
}
   0xd   :  { %s1236_s21 = smov 128   ;;  %s1237_s22 = smov 8  }
   0xe   :  { %35 = dma.hbm_to_vmem [thread:$0]  %s1292_s1, 8192, %s30_s19, [#allocation6], %s1236_s21, %s1236_s21, %s1237_s22  }
   0xf   :  { %s1238_s25 = smov [#allocation8]   ;;  %s1239_s27 = smov [#allocation2]  }
  0x10   :  { %s51_s26 = sshll.u32 %s1238_s25, 4  ;;  %s20_s28 = sshll.u32 %s1239_s27, 4  ;;  %s52_s26 = int_to_ptr.vmem [resolvable:$true] %s51_s26  ;;  %s21_s28 = int_to_ptr.vmem [resolvable:$true] %s20_s28 }
  0x11   :  { %s1135_s29 = scalar_lea.vmem %s52_s26, 4096  ;;  %p1140_p6 = scmp.lt.s32.totalorder %s52_s26, %s52_s26 }
  0x12   :  { %p1136_p5 = scmp.ne.s32.totalorder %s52_s26, %s1135_s29  ;;  %p1141_p7 = scmp.lt.s32.totalorder %s1135_s29, %s1135_s29 }
  0x14   :  { %p1142_p8 = por %p1141_p7, %p1140_p6 }
  0x16   :  { %p1143_p9 = pnand %p1142_p8, %p1136_p5 }
  0x18   :  { %1146 = shalt.err (!%p1143_p9)
}
  0x19   :  { %57 = dma.hbm_to_vmem [thread:$0]  %s1294_s3, 4096, %s52_s26, [#allocation9], %s1236_s21, %s1236_s21, %s1237_s22  }
  0x1a   :  { %s1155_s7 = scalar_lea.vmem %s21_s28, 512  ;;  %p1160_p11 = scmp.lt.s32.totalorder %s21_s28, %s21_s28 }
  0x1b   :  { %p1156_p10 = scmp.ne.s32.totalorder %s21_s28, %s1155_s7  ;;  %p1161_p12 = scmp.lt.s32.totalorder %s1155_s7, %s1155_s7 }
  0x1d   :  { %p1162_p13 = por %p1161_p12, %p1160_p11 }
  0x1f   :  { %p1163_p0 = pnand %p1162_p13, %p1156_p10 }
  0x21   :  { %1166 = shalt.err (!%p1163_p0)
}
  0x22   :  { %23 = dma.hbm_to_vmem [thread:$0]  %s1291_s0, 512, %s21_s28, [#allocation3]  }
  0x23   :  { %s1240_s9 = smov [#allocation7]   ;;  %s1241_s11 = smov [#allocation10]  }
  0x24   :  { %s42_s10 = sshll.u32 %s1240_s9, 4  ;;  %s64_s12 = sshll.u32 %s1241_s11, 4  ;;  %s43_s10 = int_to_ptr.vmem [resolvable:$true] %s42_s10  ;;  %s65_s12 = int_to_ptr.vmem [resolvable:$true] %s64_s12 }
  0x25   :  { %s1175_s13 = scalar_lea.vmem %s43_s10, 32  ;;  %p1180_p2 = scmp.lt.s32.totalorder %s43_s10, %s43_s10 }
  0x26   :  { %p1176_p1 = scmp.ne.s32.totalorder %s43_s10, %s1175_s13  ;;  %p1181_p3 = scmp.lt.s32.totalorder %s1175_s13, %s1175_s13 }
  0x28   :  { %p1182_p4 = por %p1181_p3, %p1180_p2 }
  0x2a   :  { %p1183_p5 = pnand %p1182_p4, %p1176_p1 }
  0x2c   :  { %1186 = shalt.err (!%p1183_p5)
}
  0x2d   :  { %45 = dma.hbm_to_vmem [thread:$0]  %s1293_s2, 32, %s43_s10, [#allocation6]  }
  0x2e   :  { %s1195_s15 = scalar_lea.vmem %s65_s12, 32  ;;  %p1200_p7 = scmp.lt.s32.totalorder %s65_s12, %s65_s12 }
  0x2f   :  { %p1196_p6 = scmp.ne.s32.totalorder %s65_s12, %s1195_s15  ;;  %p1201_p8 = scmp.lt.s32.totalorder %s1195_s15, %s1195_s15 }
  0x31   :  { %p1202_p9 = por %p1201_p8, %p1200_p7 }
  0x33   :  { %p1203_p10 = pnand %p1202_p9, %p1196_p6 }
  0x35   :  { %1206 = shalt.err (!%p1203_p10)
}
  0x36   :  { %67 = dma.hbm_to_vmem [thread:$0]  %s1295_s4, 32, %s65_s12, [#allocation9]  }
  0x37   :  { %1227 = dma.done.wait [#allocation3], 512  }
  0x38   :  { %1228 = vsyncadd [#allocation3], 4294966784 }
  0x39   :  { %1229 = dma.done.wait [#allocation6], 8224  }
  0x3a   :  { %1230 = vsyncadd [#allocation6], 4294959072 }
  0x3b   :  { %1231 = dma.done.wait [#allocation9], 4128  }
  0x3c   :  { %1232 = vsyncadd [#allocation9], 4294963168  ;;  %v957_v0 = vld [vmem:[#allocation5 + $0x74] ss:$8 sps:$4 sm:$0xff]   ;;  %v961_v2 = vld [vmem:[#allocation5 + $0x70] ss:$8 sps:$4 sm:$0xff]  }
  0x3d   :  { %v959_v1 = vld [vmem:[#allocation5 + $0x174] ss:$8 sps:$4 sm:$0xff]   ;;  %487 = vmatprep.subr.bf16.mxu0 %v957_v0  ;;  %v962_v3 = vld [vmem:[#allocation5 + $0x170] ss:$8 sps:$4 sm:$0xff]   ;;  %v963_v4 = vld [vmem:[#allocation5 + $0x64] ss:$8 sps:$4 sm:$0xff]  }
  0x3e   :  { %528 = vmatprep.subr.bf16.mxu1 %v959_v1  ;;  %488 = vmatpush1.bf16.msra.mxu0 %v961_v2  ;;  %v965_v5 = vld [vmem:[#allocation5 + $0x164] ss:$8 sps:$4 sm:$0xff]   ;;  %v967_v6 = vld [vmem:[#allocation5 + $0x60] ss:$8 sps:$4 sm:$0xff]   ;;  %v969_v8 = vld [vmem:[#allocation5 + $0x54] ss:$8 sps:$4 sm:$0xff]  }
  0x3f   :  { %529 = vmatpush1.bf16.msra.mxu1 %v962_v3  ;;  %489 = vmatprep.subr.bf16.mxu0 %v963_v4  ;;  %v968_v7 = vld [vmem:[#allocation5 + $0x160] ss:$8 sps:$4 sm:$0xff]   ;;  %v971_v9 = vld [vmem:[#allocation5 + $0x154] ss:$8 sps:$4 sm:$0xff]   ;;  %v973_v10 = vld [vmem:[#allocation5 + $0x50] ss:$8 sps:$4 sm:$0xff]  }
  0x40   :  { %530 = vmatprep.subr.bf16.mxu1 %v965_v5  ;;  %v974_v11 = vld [vmem:[#allocation5 + $0x150] ss:$8 sps:$4 sm:$0xff]   ;;  %v975_v12 = vld [vmem:[#allocation5 + $0x44] ss:$8 sps:$4 sm:$0xff]   ;;  %v979_v14 = vld [vmem:[#allocation5 + $0x40] ss:$8 sps:$4 sm:$0xff]  }
  0x41   :  { %v977_v13 = vld [vmem:[#allocation5 + $0x144] ss:$8 sps:$4 sm:$0xff]   ;;  %v980_v15 = vld [vmem:[#allocation5 + $0x140] ss:$8 sps:$4 sm:$0xff]   ;;  %v981_v16 = vld [vmem:[#allocation5 + $0x34] ss:$8 sps:$4 sm:$0xff]  }
  0x42   :  { %490 = vmatpush1.bf16.msra.mxu0 %v967_v6  ;;  %v983_v17 = vld [vmem:[#allocation5 + $0x134] ss:$8 sps:$4 sm:$0xff]   ;;  %v985_v18 = vld [vmem:[#allocation5 + $0x30] ss:$8 sps:$4 sm:$0xff]   ;;  %v987_v20 = vld [vmem:[#allocation5 + $0x24] ss:$8 sps:$4 sm:$0xff]  }
  0x43   :  { %531 = vmatpush1.bf16.msra.mxu1 %v968_v7  ;;  %491 = vmatprep.subr.bf16.mxu0 %v969_v8  ;;  %v986_v19 = vld [vmem:[#allocation5 + $0x130] ss:$8 sps:$4 sm:$0xff]   ;;  %v989_v21 = vld [vmem:[#allocation5 + $0x124] ss:$8 sps:$4 sm:$0xff]   ;;  %v991_v22 = vld [vmem:[#allocation5 + $0x20] ss:$8 sps:$4 sm:$0xff]  }
  0x44   :  { %532 = vmatprep.subr.bf16.mxu1 %v971_v9  ;;  %v992_v23 = vld [vmem:[#allocation5 + $0x120] ss:$8 sps:$4 sm:$0xff]   ;;  %v993_v24 = vld [vmem:[#allocation5 + $0x14] ss:$8 sps:$4 sm:$0xff]   ;;  %v997_v26 = vld [vmem:[#allocation5 + $0x10] ss:$8 sps:$4 sm:$0xff]  }
  0x45   :  { %v995_v25 = vld [vmem:[#allocation5 + $0x114] ss:$8 sps:$4 sm:$0xff]   ;;  %v998_v27 = vld [vmem:[#allocation5 + $0x110] ss:$8 sps:$4 sm:$0xff]   ;;  %v999_v28 = vld [vmem:[#allocation5 + $0x4] ss:$8 sps:$4 sm:$0xff]  }
  0x46   :  { %492 = vmatpush1.bf16.msra.mxu0 %v973_v10  ;;  %v1001_v29 = vld [vmem:[#allocation5 + $0x104] ss:$8 sps:$4 sm:$0xff]   ;;  %v1003_v30 = vld [vmem:[#allocation5] ss:$8 sps:$4 sm:$0xff]   ;;  %v1005_v32 = vld [vmem:[#allocation5 + $0xf4] ss:$8 sps:$4 sm:$0xff]  }
  0x47   :  { %533 = vmatpush1.bf16.msra.mxu1 %v974_v11  ;;  %493 = vmatprep.subr.bf16.mxu0 %v975_v12  ;;  %v1004_v31 = vld [vmem:[#allocation5 + $0x100] ss:$8 sps:$4 sm:$0xff]   ;;  %v1007_v33 = vld [vmem:[#allocation5 + $0x1f4] ss:$8 sps:$4 sm:$0xff]   ;;  %v1009_v34 = vld [vmem:[#allocation5 + $0xf0] ss:$8 sps:$4 sm:$0xff]  }
  0x48   :  { %534 = vmatprep.subr.bf16.mxu1 %v977_v13  ;;  %v1010_v35 = vld [vmem:[#allocation5 + $0x1f0] ss:$8 sps:$4 sm:$0xff]   ;;  %v1011_v36 = vld [vmem:[#allocation5 + $0xe4] ss:$8 sps:$4 sm:$0xff]   ;;  %v1015_v38 = vld [vmem:[#allocation5 + $0xe0] ss:$8 sps:$4 sm:$0xff]  }
  0x49   :  { %v1013_v37 = vld [vmem:[#allocation5 + $0x1e4] ss:$8 sps:$4 sm:$0xff]   ;;  %v1016_v39 = vld [vmem:[#allocation5 + $0x1e0] ss:$8 sps:$4 sm:$0xff]   ;;  %v1017_v40 = vld [vmem:[#allocation5 + $0xd4] ss:$8 sps:$4 sm:$0xff]  }
  0x4a   :  { %494 = vmatpush1.bf16.msra.mxu0 %v979_v14  ;;  %v1019_v41 = vld [vmem:[#allocation5 + $0x1d4] ss:$8 sps:$4 sm:$0xff]   ;;  %v1021_v42 = vld [vmem:[#allocation5 + $0xd0] ss:$8 sps:$4 sm:$0xff]   ;;  %v1023_v44 = vld [vmem:[#allocation5 + $0xc4] ss:$8 sps:$4 sm:$0xff]  }
  0x4b   :  { %535 = vmatpush1.bf16.msra.mxu1 %v980_v15  ;;  %495 = vmatprep.subr.bf16.mxu0 %v981_v16  ;;  %v1022_v43 = vld [vmem:[#allocation5 + $0x1d0] ss:$8 sps:$4 sm:$0xff]   ;;  %v1025_v45 = vld [vmem:[#allocation5 + $0x1c4] ss:$8 sps:$4 sm:$0xff]   ;;  %v1027_v47 = vld [vmem:[#allocation5 + $0xc0] ss:$8 sps:$4 sm:$0xff]  }
  0x4c   :  { %536 = vmatprep.subr.bf16.mxu1 %v983_v17  ;;  %v84_v46 = vld [vmem:[#allocation2 + $0x8] sm:$0xff]  ;;  %v86_v50 = vld [vmem:[#allocation2 + $0x18] sm:$0xff]  ;;  %v83_v4 = vld [vmem:[#allocation2] sm:$0xff]  ;;  %s1242_s2 = smov [#allocation11]  }
  0x4d   :  { %v1028_v48 = vld [vmem:[#allocation5 + $0x1c0] ss:$8 sps:$4 sm:$0xff]   ;;  %v88_v49 = vpack.c.bf16 %v84_v46, %v84_v46  ;;  %v1029_v51 = vld [vmem:[#allocation5 + $0xb4] ss:$8 sps:$4 sm:$0xff]   ;;  %v90_v52 = vpack.c.bf16 %v86_v50, %v86_v50  ;;  %v1033_v54 = vld [vmem:[#allocation5 + $0xb0] ss:$8 sps:$4 sm:$0xff]   ;;  %v87_v7 = vpack.c.bf16 %v83_v4, %v83_v4 }
  0x4e   :  { %496 = vmatpush1.bf16.msra.mxu0 %v985_v18  ;;  %v1031_v53 = vld [vmem:[#allocation5 + $0x1b4] ss:$8 sps:$4 sm:$0xff]   ;;  %v1034_v55 = vld [vmem:[#allocation5 + $0x1b0] ss:$8 sps:$4 sm:$0xff]   ;;  %v1035_v56 = vld [vmem:[#allocation5 + $0xa4] ss:$8 sps:$4 sm:$0xff]  }
  0x4f   :  { %537 = vmatpush1.bf16.msra.mxu1 %v986_v19  ;;  %497 = vmatprep.subr.bf16.mxu0 %v987_v20  ;;  %v1037_v57 = vld [vmem:[#allocation5 + $0x1a4] ss:$8 sps:$4 sm:$0xff]   ;;  %v1039_v58 = vld [vmem:[#allocation5 + $0xa0] ss:$8 sps:$4 sm:$0xff]   ;;  %v1041_v60 = vld [vmem:[#allocation5 + $0x94] ss:$8 sps:$4 sm:$0xff]  }
  0x50   :  { %538 = vmatprep.subr.bf16.mxu1 %v989_v21  ;;  %519 = vmatprep.mubr.bf16.mxu0 %v88_v49  ;;  %v1040_v59 = vld [vmem:[#allocation5 + $0x1a0] ss:$8 sps:$4 sm:$0xff]   ;;  %v1043_v61 = vld [vmem:[#allocation5 + $0x194] ss:$8 sps:$4 sm:$0xff]   ;;  %v1045_v62 = vld [vmem:[#allocation5 + $0x90] ss:$8 sps:$4 sm:$0xff]  }
  0x51   :  { %560 = vmatprep.mubr.bf16.mxu1 %v90_v52  ;;  %v1046_v63 = vld [vmem:[#allocation5 + $0x190] ss:$8 sps:$4 sm:$0xff]   ;;  %v1047_v0 = vld [vmem:[#allocation5 + $0x84] ss:$8 sps:$4 sm:$0xff]   ;;  %v1051_v2 = vld [vmem:[#allocation5 + $0x80] ss:$8 sps:$4 sm:$0xff]  }
  0x52   :  { %498 = vmatpush1.bf16.msra.mxu0 %v991_v22  ;;  %v1049_v1 = vld [vmem:[#allocation5 + $0x184] ss:$8 sps:$4 sm:$0xff]   ;;  %v1052_v3 = vld [vmem:[#allocation5 + $0x180] ss:$8 sps:$4 sm:$0xff]   ;;  %v85_v5 = vld [vmem:[#allocation2 + $0x10] sm:$0xff]  ;;  %s842_s4 = sshll.u32 %s1242_s2, 4  ;;  %s843_s4 = int_to_ptr.vmem [resolvable:$true] %s842_s4 }
  0x53   :  { %539 = vmatpush1.bf16.msra.mxu1 %v992_v23  ;;  %499 = vmatprep.subr.bf16.mxu0 %v993_v24  ;;  %v1055_v6 = vld [vmem:[#allocation8 + $0x74] ss:$8 sps:$4 sm:$0xff]   ;;  %v89_v8 = vpack.c.bf16 %v85_v5, %v85_v5  ;;  %v1053_v9 = vld [vmem:[#allocation8 + $0x70] ss:$8 sps:$4 sm:$0xff]   ;;  %v1058_v10 = vld [vmem:[#allocation8 + $0x64] ss:$8 sps:$4 sm:$0xff]   ;;  %p1212_p12 = scmp.lt.s32.totalorder %s843_s4, %s843_s4 }
  0x54   :  { %540 = vmatprep.subr.bf16.mxu1 %v995_v25  ;;  %v1056_v11 = vld [vmem:[#allocation8 + $0x60] ss:$8 sps:$4 sm:$0xff]   ;;  %v1061_v12 = vld [vmem:[#allocation8 + $0x54] ss:$8 sps:$4 sm:$0xff]   ;;  %v1059_v13 = vld [vmem:[#allocation8 + $0x50] ss:$8 sps:$4 sm:$0xff]  }
  0x55   :  { %v1064_v14 = vld [vmem:[#allocation8 + $0x44] ss:$8 sps:$4 sm:$0xff]   ;;  %v1062_v15 = vld [vmem:[#allocation8 + $0x40] ss:$8 sps:$4 sm:$0xff]   ;;  %v1067_v16 = vld [vmem:[#allocation8 + $0x34] ss:$8 sps:$4 sm:$0xff]  }
  0x56   :  { %500 = vmatpush1.bf16.msra.mxu0 %v997_v26  ;;  %v1065_v17 = vld [vmem:[#allocation8 + $0x30] ss:$8 sps:$4 sm:$0xff]   ;;  %v1070_v18 = vld [vmem:[#allocation8 + $0x24] ss:$8 sps:$4 sm:$0xff]   ;;  %v1068_v19 = vld [vmem:[#allocation8 + $0x20] ss:$8 sps:$4 sm:$0xff]  }
  0x57   :  { %541 = vmatpush1.bf16.msra.mxu1 %v998_v27  ;;  %501 = vmatprep.subr.bf16.mxu0 %v999_v28  ;;  %v1073_v20 = vld [vmem:[#allocation8 + $0x14] ss:$8 sps:$4 sm:$0xff]   ;;  %v1071_v21 = vld [vmem:[#allocation8 + $0x10] ss:$8 sps:$4 sm:$0xff]   ;;  %v1076_v22 = vld [vmem:[#allocation8 + $0x4] ss:$8 sps:$4 sm:$0xff]  }
  0x58   :  { %542 = vmatprep.subr.bf16.mxu1 %v1001_v29  ;;  %v1074_v23 = vld [vmem:[#allocation8] ss:$8 sps:$4 sm:$0xff]   ;;  %v1079_v24 = vld [vmem:[#allocation8 + $0xf4] ss:$8 sps:$4 sm:$0xff]   ;;  %v1077_v25 = vld [vmem:[#allocation8 + $0xf0] ss:$8 sps:$4 sm:$0xff]  }
  0x59   :  { %v1082_v26 = vld [vmem:[#allocation8 + $0xe4] ss:$8 sps:$4 sm:$0xff]   ;;  %v1080_v27 = vld [vmem:[#allocation8 + $0xe0] ss:$8 sps:$4 sm:$0xff]   ;;  %v1085_v28 = vld [vmem:[#allocation8 + $0xd4] ss:$8 sps:$4 sm:$0xff]  }
  0x5a   :  { %502 = vmatpush1.bf16.msra.mxu0 %v1003_v30  ;;  %v1083_v29 = vld [vmem:[#allocation8 + $0xd0] ss:$8 sps:$4 sm:$0xff]   ;;  %v1088_v30 = vld [vmem:[#allocation8 + $0xc4] ss:$8 sps:$4 sm:$0xff]   ;;  %s1207_s17 = scalar_lea.vmem %s843_s4, 256 }
  0x5b   :  { %543 = vmatpush1.bf16.msra.mxu1 %v1004_v31  ;;  %503 = vmatprep.subr.bf16.mxu0 %v1005_v32  ;;  %v1086_v31 = vld [vmem:[#allocation8 + $0xc0] ss:$8 sps:$4 sm:$0xff]   ;;  %v1091_v32 = vld [vmem:[#allocation8 + $0xb4] ss:$8 sps:$4 sm:$0xff]   ;;  %p1208_p11 = scmp.ne.s32.totalorder %s843_s4, %s1207_s17  ;;  %p1213_p13 = scmp.lt.s32.totalorder %s1207_s17, %s1207_s17 }
  0x5c   :  { %544 = vmatprep.subr.bf16.mxu1 %v1007_v33  ;;  %v1089_v33 = vld [vmem:[#allocation8 + $0xb0] ss:$8 sps:$4 sm:$0xff]  }
  0x5d   :  { %p1214_p0 = por %p1213_p13, %p1212_p12 }
  0x5e   :  { %504 = vmatpush2.bf16.msra.mxu0 %v1009_v34  ;;  %v1094_v34 = vld [vmem:[#allocation8 + $0xa4] ss:$8 sps:$4 sm:$0xff]  }
  0x5f   :  { %545 = vmatpush2.bf16.msra.mxu1 %v1010_v35  ;;  %505 = vmatprep.subr.bf16.mxu0 %v1011_v36  ;;  %v1092_v35 = vld [vmem:[#allocation8 + $0xa0] ss:$8 sps:$4 sm:$0xff]   ;;  %v1097_v36 = vld [vmem:[#allocation8 + $0x94] ss:$8 sps:$4 sm:$0xff]   ;;  %p1215_p1 = pnand %p1214_p0, %p1208_p11 }
  0x60   :  { %546 = vmatprep.subr.bf16.mxu1 %v1013_v37  ;;  %v1095_v37 = vld [vmem:[#allocation8 + $0x90] ss:$8 sps:$4 sm:$0xff]  }
  0x62   :  { %506 = vmatpush2.bf16.msra.mxu0 %v1015_v38  ;;  %v1100_v38 = vld [vmem:[#allocation8 + $0x84] ss:$8 sps:$4 sm:$0xff]  }
  0x63   :  { %547 = vmatpush2.bf16.msra.mxu1 %v1016_v39  ;;  %507 = vmatprep.subr.bf16.mxu0 %v1017_v40  ;;  %v1098_v39 = vld [vmem:[#allocation8 + $0x80] ss:$8 sps:$4 sm:$0xff]   ;;  %v157_v40 = vlaneseq }
  0x64   :  { %548 = vmatprep.subr.bf16.mxu1 %v1019_v41 }
  0x65   :  { %v158_v41 = vshrl.u32 %v157_v40, 7 }
  0x66   :  { %508 = vmatpush2.bf16.msra.mxu0 %v1021_v42 }
  0x67   :  { %549 = vmatpush2.bf16.msra.mxu1 %v1022_v43  ;;  %509 = vmatprep.subr.bf16.mxu0 %v1023_v44  ;;  %v159_v42 = vsub.s32 0, %v158_v41  ;;  %v155_v43 = vld [vmem:[#allocation7] sm:$0x3]  ;;  %v163_v44 = vsub.s32 1, %v158_v41 }
  0x68   :  { %550 = vmatprep.subr.bf16.mxu1 %v1025_v45 }
  0x69   :  { %v160_v45 = vrot.slane %v155_v43, %v159_v42  ;;  %v164_v46 = vrot.slane %v155_v43, %v163_v44 }
  0x6a   :  { %510 = vmatpush2.bf16.msra.mxu0 %v1027_v47 }
  0x6b   :  { %551 = vmatpush2.bf16.msra.mxu1 %v1028_v48  ;;  %511 = vmatprep.subr.bf16.mxu0 %v1029_v51 }
  0x6c   :  { %552 = vmatprep.subr.bf16.mxu1 %v1031_v53 }
  0x6e   :  { %512 = vmatpush2.bf16.msra.mxu0 %v1033_v54 }
  0x6f   :  { %553 = vmatpush2.bf16.msra.mxu1 %v1034_v55  ;;  %513 = vmatprep.subr.bf16.mxu0 %v1035_v56 }
  0x70   :  { %554 = vmatprep.subr.bf16.mxu1 %v1037_v57 }
  0x72   :  { %514 = vmatpush2.bf16.msra.mxu0 %v1039_v58 }
  0x73   :  { %555 = vmatpush2.bf16.msra.mxu1 %v1040_v59  ;;  %515 = vmatprep.subr.bf16.mxu0 %v1041_v60 }
  0x74   :  { %556 = vmatprep.subr.bf16.mxu1 %v1043_v61 }
  0x76   :  { %516 = vmatpush2.bf16.msra.mxu0 %v1045_v62 }
  0x77   :  { %557 = vmatpush2.bf16.msra.mxu1 %v1046_v63  ;;  %517 = vmatprep.subr.bf16.mxu0 %v1047_v0  ;;  %v605_v63 = vld [vmem:[#allocation10] sm:$0x3] }
  0x78   :  { %558 = vmatprep.subr.bf16.mxu1 %v1049_v1  ;;  %v610_v0 = vrot.slane %v605_v63, %v159_v42  ;;  %v614_v1 = vrot.slane %v605_v63, %v163_v44 }
  0x7a   :  { %518 = vmatpush2.bf16.msra.mxu0 %v1051_v2 }
  0x7b   :  { %559 = vmatpush2.bf16.msra.mxu1 %v1052_v3  ;;  %777 = vmatprep.subr.bf16.mxu0 %v1055_v6 }
  0x7d   :  { %520 = vmatmul.mubr.bf16.vlgmr.msra.gmra.mxu0 %v87_v7 }
  0x7e   :  { %561 = vmatmul.mubr.bf16.vlgmr.msra.gmra.mxu1 %v89_v8  ;;  %778 = vmatpush1.bf16.msra.mxu0 %v1053_v9 }
  0x7f   :  { %779 = vmatprep.subr.bf16.mxu0 %v1058_v10 }
  0x82   :  { %780 = vmatpush1.bf16.msra.mxu0 %v1056_v11 }
  0x83   :  { %781 = vmatprep.subr.bf16.mxu0 %v1061_v12 }
  0x86   :  { %782 = vmatpush1.bf16.msra.mxu0 %v1059_v13 }
  0x87   :  { %783 = vmatprep.subr.bf16.mxu0 %v1064_v14 }
  0x8a   :  { %784 = vmatpush1.bf16.msra.mxu0 %v1062_v15 }
  0x8b   :  { %785 = vmatprep.subr.bf16.mxu0 %v1067_v16 }
  0x8e   :  { %786 = vmatpush1.bf16.msra.mxu0 %v1065_v17 }
  0x8f   :  { %787 = vmatprep.subr.bf16.mxu0 %v1070_v18 }
  0x92   :  { %788 = vmatpush1.bf16.msra.mxu0 %v1068_v19 }
  0x93   :  { %789 = vmatprep.subr.bf16.mxu0 %v1073_v20 }
  0x96   :  { %790 = vmatpush1.bf16.msra.mxu0 %v1071_v21 }
  0x97   :  { %791 = vmatprep.subr.bf16.mxu0 %v1076_v22 }
  0x9a   :  { %792 = vmatpush1.bf16.msra.mxu0 %v1074_v23 }
  0x9b   :  { %793 = vmatprep.subr.bf16.mxu0 %v1079_v24 }
  0x9e   :  { %794 = vmatpush2.bf16.msra.mxu0 %v1077_v25 }
  0x9f   :  { %795 = vmatprep.subr.bf16.mxu0 %v1082_v26 }
  0xa2   :  { %796 = vmatpush2.bf16.msra.mxu0 %v1080_v27 }
  0xa3   :  { %797 = vmatprep.subr.bf16.mxu0 %v1085_v28 }
  0xa6   :  { %798 = vmatpush2.bf16.msra.mxu0 %v1083_v29 }
  0xa7   :  { %799 = vmatprep.subr.bf16.mxu0 %v1088_v30 }
  0xaa   :  { %800 = vmatpush2.bf16.msra.mxu0 %v1086_v31 }
  0xab   :  { %801 = vmatprep.subr.bf16.mxu0 %v1091_v32 }
  0xae   :  { %802 = vmatpush2.bf16.msra.mxu0 %v1089_v33 }
  0xaf   :  { %803 = vmatprep.subr.bf16.mxu0 %v1094_v34 }
  0xb2   :  { %804 = vmatpush2.bf16.msra.mxu0 %v1092_v35 }
  0xb3   :  { %805 = vmatprep.subr.bf16.mxu0 %v1097_v36 }
  0xb6   :  { %806 = vmatpush2.bf16.msra.mxu0 %v1095_v37 }
  0xb7   :  { %807 = vmatprep.subr.bf16.mxu0 %v1100_v38 }
  0xba   :  { %808 = vmatpush2.bf16.msra.mxu0 %v1098_v39 }
 0x13d   :  { %v521_v47 = vpop.f32.mrf.mxu0 }
 0x13e   :  { %v562_v48 = vpop.f32.mrf.mxu1  ;;  %v522_v49 = vadd.f32 %v521_v47, %v160_v45 }
 0x13f   :  { %v523_v50 = vpop.f32.mrf.mxu0 }
 0x140   :  { %v564_v51 = vpop.f32.mrf.mxu1  ;;  %v563_v52 = vadd.f32 %v562_v48, %v522_v49  ;;  %v524_v53 = vadd.f32 %v523_v50, %v164_v46 }
 0x141   :  { %v525_v54 = vpop.f32.mrf.mxu0 }
 0x142   :  { %v566_v55 = vpop.f32.mrf.mxu1  ;;  %v565_v56 = vadd.f32 %v564_v51, %v524_v53  ;;  %v569_v57 = vmax.f32 %v563_v52, 0.0 }
 0x143   :  { %v526_v58 = vpop.f32.mrf.mxu0 }
 0x144   :  { %v567_v59 = vpop.f32.mrf.mxu1  ;;  %v570_v60 = vmax.f32 %v565_v56, 0.0  ;;  %v571_v62 = vpack.c.bf16 %v569_v57, %v569_v57 }
 0x146   :  { %v572_v61 = vpack.c.bf16 %v570_v60, %v570_v60 }
 0x148   :  { %809 = vmatprep.mubr.bf16.mxu0 %v572_v61 }
 0x149   :  { %810 = vmatmul.mubr.bf16.vlgmr.msra.gmra.mxu0 %v571_v62 }
 0x209   :  { %v811_v2 = vpop.f32.mrf.mxu0 }
 0x20a   :  { %v812_v4 = vadd.f32 %v811_v2, %v610_v0 }
 0x20b   :  { %v813_v3 = vpop.f32.mrf.mxu0 }
 0x20c   :  { %v814_v5 = vadd.f32 %v813_v3, %v614_v1 }
 0x20d   :  { %v815_v6 = vpop.f32.mrf.mxu0 }
 0x20e   :  { %v818_v7 = vmax.f32 %v812_v4, %v814_v5 }
 0x20f   :  { %v816_v8 = vpop.f32.mrf.mxu0 }
 0x210   :  { %819 = vmax.xlane.f32.xlu0 %v818_v7 }
 0x299   :  { %v820_v9 = vpop.xlane.xlu0 %819 }
 0x29a   :  { %v821_v10 = vsub.f32 %v812_v4, %v820_v9  ;;  %v822_v11 = vsub.f32 %v814_v5, %v820_v9 }
 0x29c   :  { %v823_v12 = vmul.f32 1.442695, %v821_v10  ;;  %v825_v13 = vmul.f32 1.442695, %v822_v11 }
 0x29e   :  { %1101 = vpow2.f32 %v823_v12 }
 0x29f   :  { %1103 = vpow2.f32 %v825_v13 }
 0x2ab   :  { %v1102_v14 = vpop.eup %1101 }
 0x2ac   :  { %v1104_v15 = vpop.eup %1103 }
 0x2ad   :  { %v827_v16 = vadd.f32 %v1104_v15, %v1102_v14 }
 0x2af   :  { %828 = vadd.xlane.f32.xlu0 %v827_v16 }
 0x338   :  { %v829_v17 = vpop.xlane.xlu0 %828 }
 0x339   :  { %1105 = vlog2.f32 %v829_v17 }
 0x346   :  { %v1106_v18 = vpop.eup %1105 }
 0x347   :  { %v831_v19 = vmul.f32 0.6931472, %v1106_v18 }
 0x349   :  { %v832_v20 = vsub.f32 %v821_v10, %v831_v19  ;;  %v833_v21 = vsub.f32 %v822_v11, %v831_v19 }
 0x34b   :  { %834 = vst [vmem:[#allocation11] sm:$0xff] %v832_v20  ;;  %835 = vst [vmem:[#allocation11 + $0x8] sm:$0xff] %v833_v21 }
 0x34c   :  { %1218 = shalt.err (!%p1215_p1)
}
 0x34d   :  { %845 = dma.vmem_to_hbm [thread:$0]  %s843_s4, 256, %s1296_s5, [#allocation4]  }
 0x34e   :  { %1233 = dma.done.wait [#allocation4], 256  }
 0x34f   :  { %1234 = vsyncadd [#allocation4], 4294967040 }
 0x350   :  { %849 = vsyncpa [#allocation3], 1 }
 0x351   :  { %850 = vsyncpa [#allocation6], 1 }
 0x352   :  { %851 = vsyncpa [#allocation9], 1 }
 0x353   :  { %852 = vsyncpa [#allocation4], 1 }

</bundles_post_ra>
